<compile_context>
chip_gen: v6e
topology: v6e:2x2x1
jax: 0.10.0
libtpu: 0.0.40
codegen_flags: <defaults>
</compile_context>

<pallas_src>
import jax
import jax.numpy as jnp
import numpy as np
from jax.experimental import pallas as pl
from jax.experimental.pallas import tpu as pltpu

DROPOUT_P = 0.2
K_SIZE = 3
LAYERS = 64
CIN = 3
EPS = 1e-5

K_REAL = K_SIZE * K_SIZE * CIN   # 27 real contraction elements per output pixel
K_PAD = 32                       # contraction padded to 32
PACK = 4                         # output rows packed per lane-dense row (4*64 = 256 lanes)
BLOCK_M4_MAX = 1024              # packed rows per grid step (sweep 512-2048 on real shapes)


def _round_up(x, m):
    return ((x + m - 1) // m) * m


def convblock_gemm_kernel(a_ref, w_ref, b_ref, o_ref):
    """Fused conv-as-GEMM + folded-BN bias + ReLU.

    a_ref: (block_m4, PACK*K_PAD)   bf16  packed im2col rows (lane-dense, 128)
    w_ref: (PACK*K_PAD, PACK*Cout)  bf16  block-diagonal folded conv weights
    b_ref: (1, PACK*Cout)           f32   folded conv bias + BN shift (tiled x4)
    o_ref: (block_m4, PACK*Cout)    bf16  packed output rows (lane-dense, 256)
    """
    acc = jnp.dot(a_ref[...], w_ref[...], preferred_element_type=jnp.float32)
    o_ref[...] = jnp.maximum(acc + b_ref[...], 0.0).astype(o_ref.dtype)


def conv_block_forward(x_nchw, w_hwio, b, gamma, beta, run_mean, run_var, eps=EPS):
    N, Cin, H, W = x_nchw.shape
    Cout = w_hwio.shape[-1]

    # ---- Fold BN (inference) into conv weights / bias (one-off, f32) ----
    scale = gamma / jnp.sqrt(run_var + eps)                       # (Cout,)
    w_folded = w_hwio.astype(jnp.float32) * scale                 # (3,3,Cin,Cout)
    bias_folded = b * scale + (beta - run_mean * scale)           # (Cout,)

    # ---- im2col in the wrapper, done entirely in bf16 (halves wrapper bytes) ----
    x = jnp.transpose(x_nchw, (0, 2, 3, 1)).astype(jnp.bfloat16)  # NHWC, bf16
    xp = jnp.pad(x, ((0, 0), (1, 1), (1, 1), (0, 0)))
    taps = [xp[:, ky:ky + H, kx:kx + W, :]
            for ky in range(K_SIZE) for kx in range(K_SIZE)]
    patches = jnp.concatenate(taps, axis=-1)                      # (N,H,W,27) bf16
    patches = jnp.pad(patches, ((0, 0), (0, 0), (0, 0), (0, K_PAD - K_REAL)))

    # ---- M padding / tile-size selection (keep M_pad == grid * PACK * block_m4) ----
    M = N * H * W
    m4_total = pl.cdiv(M, PACK)
    block_m4 = min(BLOCK_M4_MAX, _round_up(m4_total, 64))         # multiple of 64 rows
    M4 = _round_up(m4_total, block_m4)
    M_pad = M4 * PACK

    A = patches.reshape(M, K_PAD)
    A = jnp.pad(A, ((0, M_pad - M), (0, 0)))
    A4 = A.reshape(M4, PACK * K_PAD)                              # free row-major reshape

    # ---- Block-diagonal weights: diag(W, W, W, W) with W = (32, Cout) ----
    w2d = jnp.pad(w_folded.reshape(K_REAL, Cout), ((0, K_PAD - K_REAL), (0, 0)))
    eye = jnp.eye(PACK, dtype=jnp.float32)
    W4 = jnp.einsum("pq,kc->pkqc", eye, w2d).reshape(PACK * K_PAD, PACK * Cout)
    W4 = W4.astype(jnp.bfloat16)
    bias4 = jnp.tile(bias_folded, PACK).reshape(1, PACK * Cout).astype(jnp.float32)

    # ---- Cost estimate so XLA schedules surrounding fusions around the call ----
    flops = 2 * M4 * (PACK * K_PAD) * (PACK * Cout)
    bytes_accessed = (M4 * PACK * K_PAD * 2            # bf16 LHS
                      + PACK * K_PAD * PACK * Cout * 2  # bf16 weights
                      + PACK * Cout * 4                 # f32 bias
                      + M4 * PACK * Cout * 2)           # bf16 output
    cost = pl.CostEstimate(flops=flops, transcendentals=0,
                           bytes_accessed=bytes_accessed)

    out4 = pl.pallas_call(
        convblock_gemm_kernel,
        out_shape=jax.ShapeDtypeStruct((M4, PACK * Cout), jnp.bfloat16),
        grid_spec=pltpu.PrefetchScalarGridSpec(
            num_scalar_prefetch=0,
            grid=(M4 // block_m4,),
            in_specs=[
                pl.BlockSpec((block_m4, PACK * K_PAD), lambda i: (i, 0)),
                pl.BlockSpec((PACK * K_PAD, PACK * Cout), lambda i: (0, 0)),
                pl.BlockSpec((1, PACK * Cout), lambda i: (0, 0)),
            ],
            out_specs=pl.BlockSpec((block_m4, PACK * Cout), lambda i: (i, 0)),
        ),
        compiler_params=pltpu.CompilerParams(
            dimension_semantics=("parallel",),
            vmem_limit_bytes=32 * 1024 * 1024),
        cost_estimate=cost,
    )(A4, W4, bias4)

    # Unpack: (M4, 4*Cout) -> (M_pad, Cout) is a free row-major reshape; the
    # f32 cast fuses with the final NHWC->NCHW transpose so the public dtype
    # matches the PyTorch module.
    out = out4.reshape(M_pad, Cout)[:M]
    out_nhwc = out.reshape(N, H, W, Cout)
    return jnp.transpose(out_nhwc, (0, 3, 1, 2)).astype(jnp.float32)   # NCHW f32


def reference_forward(x_nchw, w_hwio, b, gamma, beta, run_mean, run_var, eps=EPS):
    w_oihw = jnp.transpose(w_hwio, (3, 2, 0, 1))
    y = jax.lax.conv_general_dilated(
        x_nchw, w_oihw, window_strides=(1, 1), padding=((1, 1), (1, 1)),
        dimension_numbers=("NCHW", "OIHW", "NCHW"))
    y = y + b.reshape(1, -1, 1, 1)
    y = (y - run_mean.reshape(1, -1, 1, 1)) / jnp.sqrt(
        run_var.reshape(1, -1, 1, 1) + eps)
    y = y * gamma.reshape(1, -1, 1, 1) + beta.reshape(1, -1, 1, 1)
    return jnp.maximum(y, 0.0)


if __name__ == "__main__":
    key = jax.random.PRNGKey(0)
    kx, kw, kb = jax.random.split(key, 3)

    # Small deterministic example consistent with the module: N=2, Cin=3, 16x16.
    x = jax.random.normal(kx, (2, CIN, 16, 16), dtype=jnp.float32)

    # Deterministic parameters (shapes from nn.Conv2d(3,64,3) / BatchNorm2d(64)).
    w_hwio = jax.random.normal(kw, (K_SIZE, K_SIZE, CIN, LAYERS), jnp.float32) * 0.1
    b = jax.random.normal(kb, (LAYERS,), jnp.float32) * 0.1
    gamma = jnp.ones((LAYERS,), jnp.float32)       # BN weight
    beta = jnp.zeros((LAYERS,), jnp.float32)       # BN bias
    run_mean = jnp.zeros((LAYERS,), jnp.float32)   # BN running_mean (init)
    run_var = jnp.ones((LAYERS,), jnp.float32)     # BN running_var (init)

    out = conv_block_forward(x, w_hwio, b, gamma, beta, run_mean, run_var)
    out = jax.block_until_ready(out)

    ref = jax.block_until_ready(
        reference_forward(x, w_hwio, b, gamma, beta, run_mean, run_var))

    # Tolerance reflects bf16 MXU operands + bf16 kernel output vs f32 reference.
    np.testing.assert_allclose(np.asarray(out), np.asarray(ref),
                               rtol=3e-2, atol=3e-2)
    assert out.shape == (2, LAYERS, 16, 16)
    print("KERNEL_OK")
</pallas_src>

<mosaic_0001>
module attributes {stable_mosaic.version = 11 : i64} {
  func.func @convblock_gemm_kernel(%arg0: i32, %arg1: memref<128x128xbf16, #tpu.memory_space<vmem>>, %arg2: memref<128x256xbf16, #tpu.memory_space<vmem>>, %arg3: memref<1x256xf32, #tpu.memory_space<vmem>>, %arg4: memref<128x256xbf16, #tpu.memory_space<vmem>>) attributes {dimension_semantics = [#tpu.dimension_semantics<parallel>], iteration_bounds = array<i64: 1>, scalar_prefetch = 0 : i64, scratch_operands = 0 : i64, tpu.core_type = #tpu.core_type<tc>, window_params = [{transform_indices = @transform_0, window_bounds = array<i64: 128, 128>}, {pipeline_mode = #tpu.pipeline_mode<synchronous>, transform_indices = @transform_1, window_bounds = array<i64: 128, 256>}, {pipeline_mode = #tpu.pipeline_mode<synchronous>, transform_indices = @transform_2, window_bounds = array<i64: 1, 256>}, {transform_indices = @transform_3, window_bounds = array<i64: 128, 256>}]} {
    %c0 = arith.constant 0 : index
    %c0_0 = arith.constant 0 : index
    %0 = vector.load %arg1[%c0, %c0_0] : memref<128x128xbf16, #tpu.memory_space<vmem>>, vector<128x128xbf16>
    %c0_1 = arith.constant 0 : index
    %c0_2 = arith.constant 0 : index
    %1 = vector.load %arg2[%c0_1, %c0_2] : memref<128x256xbf16, #tpu.memory_space<vmem>>, vector<128x256xbf16>
    %cst = arith.constant dense<0.000000e+00> : vector<128x256xf32>
    %2 = tpu.matmul %0, %1, %cst {dimension_numbers = #tpu.dot_dimension_numbers<[1], [0], [0], [1], [0, 0, 1, 1], [], []>} : vector<128x128xbf16>, vector<128x256xbf16>, vector<128x256xf32> -> vector<128x256xf32>
    %c0_3 = arith.constant 0 : index
    %c0_4 = arith.constant 0 : index
    %3 = vector.load %arg3[%c0_3, %c0_4] : memref<1x256xf32, #tpu.memory_space<vmem>>, vector<1x256xf32>
    %4 = vector.broadcast %3 : vector<1x256xf32> to vector<128x256xf32>
    %5 = arith.addf %2, %4 : vector<128x256xf32>
    %cst_5 = arith.constant 0.000000e+00 : f32
    %6 = vector.broadcast %cst_5 : f32 to vector<128x256xf32>
    %7 = arith.maximumf %5, %6 : vector<128x256xf32>
    %8 = arith.truncf %7 : vector<128x256xf32> to vector<128x256xbf16>
    %c0_6 = arith.constant 0 : index
    %c0_7 = arith.constant 0 : index
    %9 = vector.load %arg4[%c0_6, %c0_7] : memref<128x256xbf16, #tpu.memory_space<vmem>>, vector<128x256xbf16>
    tpu.vector_store %arg4[%c0_6, %c0_7], %8 {strides = array<i32>} : memref<128x256xbf16, #tpu.memory_space<vmem>>, vector<128x256xbf16>,
    return
  }
  func.func @transform_0(%arg0: i32) -> (i32, i32) {
    %c0_i32 = arith.constant 0 : i32
    %c0_i32_0 = arith.constant 0 : i32
    return %arg0, %c0_i32 : i32, i32
  }
  func.func @transform_1(%arg0: i32) -> (i32, i32) {
    %c0_i32 = arith.constant 0 : i32
    %c0_i32_0 = arith.constant 0 : i32
    %c0_i32_1 = arith.constant 0 : i32
    return %c0_i32, %c0_i32_0 : i32, i32
  }
  func.func @transform_2(%arg0: i32) -> (i32, i32) {
    %c0_i32 = arith.constant 0 : i32
    %c0_i32_0 = arith.constant 0 : i32
    %c0_i32_1 = arith.constant 0 : i32
    return %c0_i32, %c0_i32_0 : i32, i32
  }
  func.func @transform_3(%arg0: i32) -> (i32, i32) {
    %c0_i32 = arith.constant 0 : i32
    %c0_i32_0 = arith.constant 0 : i32
    return %arg0, %c0_i32 : i32, i32
  }
}

</mosaic_0001>

<bundles_post_ra>
// kernel: tpu_custom_call.1
= control target key start
LH: loop header
LB: loop body
LE: loop exit
PB: predicated region body
PF: predicated region fallthrough
CT: control target
= control target key end

     0   :  { %8 = vsyncpa [#allocation3], 0  ;;  %s759_s0 = inlined_call_operand.hbm [shape: bf16[128,128], index: 0, kind: input, shape index: {}]   ;;  %s760_s1 = inlined_call_operand.hbm [shape: bf16[128,256], index: 1, kind: input, shape index: {}]   ;;  %s761_s2 = inlined_call_operand.vmem [shape: f32[1,256], index: 2, kind: input, shape index: {}]   ;;  %s762_s3 = inlined_call_operand.hbm [shape: bf16[128,256], index: 3, kind: output, shape index: {}]  }
   0x1   :  { %9 = vsyncpa [#allocation6], 0 }
   0x2   :  { %10 = vsyncpa [#allocation4], 0  ;;  %s669_s12 = smov [#allocation2]  }
   0x3   :  { %s16_s13 = sshll.u32 %s669_s12, 4  ;;  %s17_s13 = int_to_ptr.vmem [resolvable:$true] %s16_s13 }
   0x4   :  { %s611_s14 = scalar_lea.vmem %s17_s13, 1024  ;;  %p616_p1 = scmp.lt.s32.totalorder %s17_s13, %s17_s13 }
   0x5   :  { %p612_p0 = scmp.ne.s32.totalorder %s17_s13, %s611_s14  ;;  %p617_p2 = scmp.lt.s32.totalorder %s611_s14, %s611_s14 }
   0x7   :  { %p618_p3 = por %p617_p2, %p616_p1 }
   0x9   :  { %p619_p4 = pnand %p618_p3, %p612_p0 }
   0xb   :  { %622 = shalt.err (!%p619_p4)
}
   0xc   :  { %s670_s15 = smov 64   ;;  %s671_s16 = smov 4  }
   0xd   :  { %22 = dma.hbm_to_vmem [thread:$0]  %s759_s0, 1024, %s17_s13, [#allocation3], %s670_s15, %s670_s15, %s671_s16  }
   0xe   :  { %s672_s19 = smov [#allocation5]  }
   0xf   :  { %s28_s20 = sshll.u32 %s672_s19, 4  ;;  %s29_s20 = int_to_ptr.vmem [resolvable:$true] %s28_s20 }
  0x10   :  { %s631_s21 = scalar_lea.vmem %s29_s20, 2048  ;;  %p636_p6 = scmp.lt.s32.totalorder %s29_s20, %s29_s20 }
  0x11   :  { %p632_p5 = scmp.ne.s32.totalorder %s29_s20, %s631_s21  ;;  %p637_p7 = scmp.lt.s32.totalorder %s631_s21, %s631_s21 }
  0x13   :  { %p638_p8 = por %p637_p7, %p636_p6 }
  0x15   :  { %p639_p9 = pnand %p638_p8, %p632_p5 }
  0x17   :  { %642 = shalt.err (!%p639_p9)
}
  0x18   :  { %s673_s22 = smov 128   ;;  %s674_s23 = smov 8  }
  0x19   :  { %34 = dma.hbm_to_vmem [thread:$0]  %s760_s1, 2048, %s29_s20, [#allocation6], %s673_s22, %s673_s22, %s674_s23  }
  0x1a   :  { %663 = dma.done.wait [#allocation3], 1024  }
  0x1b   :  { %664 = vsyncadd [#allocation3], 4294966272 }
  0x1c   :  { %665 = dma.done.wait [#allocation6], 2048  }
  0x1d   :  { %666 = vsyncadd [#allocation6], 4294965248  ;;  %v675_v0 = vmov 0   ;;  %v571_v1 = vld [vmem:[#allocation5 + $0x74] ss:$8 sps:$4 sm:$0xff]   ;;  %v595_v17 = vld [vmem:[#allocation2] sm:$0xff]   ;;  %v78_v25 = vlaneseq }
  0x1e   :  { %248 = vmatprep.mubr.bf16.mxu0 %v675_v0  ;;  %288 = vmatprep.mubr.bf16.mxu1 %v675_v0  ;;  %v573_v2 = vld [vmem:[#allocation5 + $0x70] ss:$8 sps:$4 sm:$0xff]   ;;  %v574_v3 = vld [vmem:[#allocation5 + $0x64] ss:$8 sps:$4 sm:$0xff]   ;;  %v576_v4 = vld [vmem:[#allocation5 + $0x60] ss:$8 sps:$4 sm:$0xff]  }
  0x1f   :  { %216 = vmatprep.subr.bf16.mxu0 %v571_v1  ;;  %547 = vmatprep.subr.bf16.mxu1 %v571_v1  ;;  %v577_v5 = vld [vmem:[#allocation5 + $0x54] ss:$8 sps:$4 sm:$0xff]   ;;  %v579_v6 = vld [vmem:[#allocation5 + $0x50] ss:$8 sps:$4 sm:$0xff]   ;;  %v580_v7 = vld [vmem:[#allocation5 + $0x44] ss:$8 sps:$4 sm:$0xff]  }
  0x20   :  { %217 = vmatpush1.bf16.msra.mxu0 %v573_v2  ;;  %555 = vmatpush1.bf16.msra.mxu1 %v573_v2  ;;  %v582_v8 = vld [vmem:[#allocation5 + $0x40] ss:$8 sps:$4 sm:$0xff]   ;;  %v583_v9 = vld [vmem:[#allocation5 + $0x34] ss:$8 sps:$4 sm:$0xff]   ;;  %v585_v10 = vld [vmem:[#allocation5 + $0x30] ss:$8 sps:$4 sm:$0xff]  }
  0x21   :  { %218 = vmatprep.subr.bf16.mxu0 %v574_v3  ;;  %548 = vmatprep.subr.bf16.mxu1 %v574_v3  ;;  %v586_v11 = vld [vmem:[#allocation5 + $0x24] ss:$8 sps:$4 sm:$0xff]   ;;  %v588_v12 = vld [vmem:[#allocation5 + $0x20] ss:$8 sps:$4 sm:$0xff]   ;;  %v589_v13 = vld [vmem:[#allocation5 + $0x14] ss:$8 sps:$4 sm:$0xff]  }
  0x22   :  { %v591_v14 = vld [vmem:[#allocation5 + $0x10] ss:$8 sps:$4 sm:$0xff]   ;;  %v592_v15 = vld [vmem:[#allocation5 + $0x4] ss:$8 sps:$4 sm:$0xff]   ;;  %v594_v16 = vld [vmem:[#allocation5] ss:$8 sps:$4 sm:$0xff]  }
  0x23   :  { %v596_v18 = vld [vmem:[#allocation2 + $0x20] sm:$0xff]   ;;  %v597_v19 = vld [vmem:[#allocation2 + $0x8] sm:$0xff]   ;;  %v599_v21 = vld [vmem:[#allocation2 + $0x10] sm:$0xff]   ;;  %v79_v26 = vshrl.u32 %v78_v25, 7 }
  0x24   :  { %219 = vmatpush1.bf16.msra.mxu0 %v576_v4  ;;  %556 = vmatpush1.bf16.msra.mxu1 %v576_v4  ;;  %v598_v20 = vld [vmem:[#allocation2 + $0x28] sm:$0xff]   ;;  %v600_v22 = vld [vmem:[#allocation2 + $0x30] sm:$0xff]   ;;  %v601_v23 = vld [vmem:[#allocation2 + $0x18] sm:$0xff]  }
  0x25   :  { %220 = vmatprep.subr.bf16.mxu0 %v577_v5  ;;  %549 = vmatprep.subr.bf16.mxu1 %v577_v5  ;;  %v602_v24 = vld [vmem:[#allocation2 + $0x38] sm:$0xff]   ;;  %v80_v27 = vsub.s32 0, %v79_v26  ;;  %v76_v28 = vld [vmem:[%s761_s2] sm:$0x3]  ;;  %v84_v29 = vsub.s32 1, %v79_v26  ;;  %s676_s2 = smov [#allocation7]  }
  0x26   :  { %s478_s26 = sshll.u32 %s676_s2, 4  ;;  %s479_s26 = int_to_ptr.vmem [resolvable:$true] %s478_s26 }
  0x27   :  { %v717_v30 = vrot.slane %v76_v28, %v80_v27  ;;  %v719_v31 = vrot.slane %v76_v28, %v84_v29  ;;  %s643_s27 = scalar_lea.vmem %s479_s26, 2048  ;;  %p648_p11 = scmp.lt.s32.totalorder %s479_s26, %s479_s26 }
  0x28   :  { %221 = vmatpush1.bf16.msra.mxu0 %v579_v6  ;;  %557 = vmatpush1.bf16.msra.mxu1 %v579_v6  ;;  %p644_p10 = scmp.ne.s32.totalorder %s479_s26, %s643_s27  ;;  %p649_p12 = scmp.lt.s32.totalorder %s643_s27, %s643_s27 }
  0x29   :  { %222 = vmatprep.subr.bf16.mxu0 %v580_v7  ;;  %550 = vmatprep.subr.bf16.mxu1 %v580_v7 }
  0x2a   :  { %p650_p13 = por %p649_p12, %p648_p11 }
  0x2c   :  { %223 = vmatpush1.bf16.msra.mxu0 %v582_v8  ;;  %558 = vmatpush1.bf16.msra.mxu1 %v582_v8  ;;  %p651_p0 = pnand %p650_p13, %p644_p10 }
  0x2d   :  { %224 = vmatprep.subr.bf16.mxu0 %v583_v9  ;;  %551 = vmatprep.subr.bf16.mxu1 %v583_v9 }
  0x30   :  { %225 = vmatpush1.bf16.msra.mxu0 %v585_v10  ;;  %559 = vmatpush1.bf16.msra.mxu1 %v585_v10 }
  0x31   :  { %226 = vmatprep.subr.bf16.mxu0 %v586_v11  ;;  %552 = vmatprep.subr.bf16.mxu1 %v586_v11 }
  0x34   :  { %227 = vmatpush1.bf16.msra.mxu0 %v588_v12  ;;  %560 = vmatpush1.bf16.msra.mxu1 %v588_v12 }
  0x35   :  { %228 = vmatprep.subr.bf16.mxu0 %v589_v13  ;;  %553 = vmatprep.subr.bf16.mxu1 %v589_v13 }
  0x38   :  { %229 = vmatpush1.bf16.msra.mxu0 %v591_v14  ;;  %561 = vmatpush1.bf16.msra.mxu1 %v591_v14 }
  0x39   :  { %230 = vmatprep.subr.bf16.mxu0 %v592_v15  ;;  %554 = vmatprep.subr.bf16.mxu1 %v592_v15 }
  0x3c   :  { %231 = vmatpush1.bf16.msra.mxu0 %v594_v16  ;;  %562 = vmatpush1.bf16.msra.mxu1 %v594_v16 }
  0x3f   :  { %249 = vmatmul.mubr.bf16.vlgmr.msra.gmra.mxu0 %v595_v17  ;;  %289 = vmatmul.mubr.bf16.vlgmr.msra.gmra.mxu1 %v596_v18 }
  0x40   :  { %258 = vmatprep.mubr.bf16.mxu0 %v675_v0  ;;  %298 = vmatprep.mubr.bf16.mxu1 %v675_v0 }
  0x47   :  { %259 = vmatmul.mubr.bf16.gmra.mxu0 %v597_v19  ;;  %299 = vmatmul.mubr.bf16.gmra.mxu1 %v598_v20 }
  0x48   :  { %268 = vmatprep.mubr.bf16.mxu0 %v675_v0  ;;  %308 = vmatprep.mubr.bf16.mxu1 %v675_v0 }
  0x4f   :  { %269 = vmatmul.mubr.bf16.gmra.mxu0 %v599_v21  ;;  %309 = vmatmul.mubr.bf16.gmra.mxu1 %v600_v22 }
  0x50   :  { %278 = vmatprep.mubr.bf16.mxu0 %v675_v0  ;;  %318 = vmatprep.mubr.bf16.mxu1 %v675_v0 }
  0x57   :  { %279 = vmatmul.mubr.bf16.gmra.mxu0 %v601_v23  ;;  %319 = vmatmul.mubr.bf16.gmra.mxu1 %v602_v24 }
  0xff   :  { %v250_v32 = vpop.f32.mrf.mxu0  ;;  %v290_v33 = vpop.f32.mrf.mxu1 }
 0x100   :  { %v251_v34 = vadd.f32 %v250_v32, %v717_v30  ;;  %v291_v35 = vadd.f32 %v290_v33, %v717_v30 }
 0x101   :  { %v252_v36 = vpop.f32.mrf.mxu0  ;;  %v292_v37 = vpop.f32.mrf.mxu1 }
 0x102   :  { %v253_v38 = vadd.f32 %v252_v36, %v719_v31  ;;  %v293_v39 = vadd.f32 %v292_v37, %v719_v31  ;;  %v329_v42 = vmax.f32 %v251_v34, 0.0  ;;  %v345_v43 = vmax.f32 %v291_v35, 0.0 }
 0x103   :  { %v254_v40 = vpop.f32.mrf.mxu0  ;;  %v294_v41 = vpop.f32.mrf.mxu1 }
 0x104   :  { %v330_v44 = vmax.f32 %v253_v38, 0.0  ;;  %v346_v45 = vmax.f32 %v293_v39, 0.0  ;;  %v255_v46 = vadd.f32 %v254_v40, %v717_v30  ;;  %v295_v47 = vadd.f32 %v294_v41, %v717_v30 }
 0x105   :  { %v256_v48 = vpop.f32.mrf.mxu0  ;;  %v296_v49 = vpop.f32.mrf.mxu1 }
 0x106   :  { %v531_v50 = vpack.c.bf16 %v330_v44, %v329_v42  ;;  %v539_v51 = vpack.c.bf16 %v346_v45, %v345_v43  ;;  %v257_v52 = vadd.f32 %v256_v48, %v719_v31  ;;  %v297_v53 = vadd.f32 %v296_v49, %v719_v31 }
 0x107   :  { %v260_v54 = vpop.f32.mrf.mxu0  ;;  %v300_v55 = vpop.f32.mrf.mxu1  ;;  %v331_v58 = vmax.f32 %v255_v46, 0.0  ;;  %v347_v59 = vmax.f32 %v295_v47, 0.0 }
 0x108   :  { %457 = vst [vmem:[#allocation7] sm:$0xff] %v531_v50  ;;  %465 = vst [vmem:[#allocation7 + $0x40] sm:$0xff] %v539_v51  ;;  %v261_v56 = vadd.f32 %v260_v54, %v717_v30  ;;  %v301_v57 = vadd.f32 %v300_v55, %v717_v30  ;;  %v332_v60 = vmax.f32 %v257_v52, 0.0  ;;  %v348_v61 = vmax.f32 %v297_v53, 0.0 }
 0x109   :  { %v262_v62 = vpop.f32.mrf.mxu0  ;;  %v302_v63 = vpop.f32.mrf.mxu1 }
 0x10a   :  { %v263_v0 = vadd.f32 %v262_v62, %v719_v31  ;;  %v303_v1 = vadd.f32 %v302_v63, %v719_v31  ;;  %v532_v2 = vpack.c.bf16 %v332_v60, %v331_v58  ;;  %v540_v3 = vpack.c.bf16 %v348_v61, %v347_v59 }
 0x10b   :  { %v264_v4 = vpop.f32.mrf.mxu0  ;;  %v304_v5 = vpop.f32.mrf.mxu1  ;;  %v333_v6 = vmax.f32 %v261_v56, 0.0  ;;  %v349_v7 = vmax.f32 %v301_v57, 0.0 }
 0x10c   :  { %v334_v8 = vmax.f32 %v263_v0, 0.0  ;;  %v350_v9 = vmax.f32 %v303_v1, 0.0  ;;  %458 = vst [vmem:[#allocation7 + $0x8] sm:$0xff] %v532_v2  ;;  %466 = vst [vmem:[#allocation7 + $0x48] sm:$0xff] %v540_v3  ;;  %v265_v10 = vadd.f32 %v264_v4, %v717_v30  ;;  %v305_v11 = vadd.f32 %v304_v5, %v717_v30 }
 0x10d   :  { %v266_v12 = vpop.f32.mrf.mxu0  ;;  %v306_v13 = vpop.f32.mrf.mxu1 }
 0x10e   :  { %v533_v14 = vpack.c.bf16 %v334_v8, %v333_v6  ;;  %v541_v15 = vpack.c.bf16 %v350_v9, %v349_v7  ;;  %v267_v16 = vadd.f32 %v266_v12, %v719_v31  ;;  %v307_v17 = vadd.f32 %v306_v13, %v719_v31 }
 0x10f   :  { %v270_v18 = vpop.f32.mrf.mxu0  ;;  %v310_v19 = vpop.f32.mrf.mxu1  ;;  %v335_v22 = vmax.f32 %v265_v10, 0.0  ;;  %v351_v23 = vmax.f32 %v305_v11, 0.0 }
 0x110   :  { %459 = vst [vmem:[#allocation7 + $0x10] sm:$0xff] %v533_v14  ;;  %467 = vst [vmem:[#allocation7 + $0x50] sm:$0xff] %v541_v15  ;;  %v271_v20 = vadd.f32 %v270_v18, %v717_v30  ;;  %v311_v21 = vadd.f32 %v310_v19, %v717_v30  ;;  %v336_v24 = vmax.f32 %v267_v16, 0.0  ;;  %v352_v25 = vmax.f32 %v307_v17, 0.0 }
 0x111   :  { %v272_v26 = vpop.f32.mrf.mxu0  ;;  %v312_v27 = vpop.f32.mrf.mxu1 }
 0x112   :  { %v273_v28 = vadd.f32 %v272_v26, %v719_v31  ;;  %v313_v29 = vadd.f32 %v312_v27, %v719_v31  ;;  %v534_v32 = vpack.c.bf16 %v336_v24, %v335_v22  ;;  %v542_v33 = vpack.c.bf16 %v352_v25, %v351_v23 }
 0x113   :  { %v274_v34 = vpop.f32.mrf.mxu0  ;;  %v314_v35 = vpop.f32.mrf.mxu1  ;;  %v337_v36 = vmax.f32 %v271_v20, 0.0  ;;  %v353_v37 = vmax.f32 %v311_v21, 0.0 }
 0x114   :  { %v338_v38 = vmax.f32 %v273_v28, 0.0  ;;  %v354_v39 = vmax.f32 %v313_v29, 0.0  ;;  %460 = vst [vmem:[#allocation7 + $0x18] sm:$0xff] %v534_v32  ;;  %468 = vst [vmem:[#allocation7 + $0x58] sm:$0xff] %v542_v33  ;;  %v275_v40 = vadd.f32 %v274_v34, %v717_v30  ;;  %v315_v41 = vadd.f32 %v314_v35, %v717_v30 }
 0x115   :  { %v276_v42 = vpop.f32.mrf.mxu0  ;;  %v316_v43 = vpop.f32.mrf.mxu1 }
 0x116   :  { %v535_v44 = vpack.c.bf16 %v338_v38, %v337_v36  ;;  %v543_v45 = vpack.c.bf16 %v354_v39, %v353_v37  ;;  %v277_v46 = vadd.f32 %v276_v42, %v719_v31  ;;  %v317_v47 = vadd.f32 %v316_v43, %v719_v31 }
 0x117   :  { %v280_v48 = vpop.f32.mrf.mxu0  ;;  %v320_v49 = vpop.f32.mrf.mxu1  ;;  %v339_v52 = vmax.f32 %v275_v40, 0.0  ;;  %v355_v53 = vmax.f32 %v315_v41, 0.0 }
 0x118   :  { %461 = vst [vmem:[#allocation7 + $0x20] sm:$0xff] %v535_v44  ;;  %469 = vst [vmem:[#allocation7 + $0x60] sm:$0xff] %v543_v45  ;;  %v281_v50 = vadd.f32 %v280_v48, %v717_v30  ;;  %v321_v51 = vadd.f32 %v320_v49, %v717_v30  ;;  %v340_v54 = vmax.f32 %v277_v46, 0.0  ;;  %v356_v55 = vmax.f32 %v317_v47, 0.0 }
 0x119   :  { %v282_v56 = vpop.f32.mrf.mxu0  ;;  %v322_v57 = vpop.f32.mrf.mxu1 }
 0x11a   :  { %v283_v58 = vadd.f32 %v282_v56, %v719_v31  ;;  %v323_v59 = vadd.f32 %v322_v57, %v719_v31  ;;  %v536_v60 = vpack.c.bf16 %v340_v54, %v339_v52  ;;  %v544_v61 = vpack.c.bf16 %v356_v55, %v355_v53 }
 0x11b   :  { %v284_v62 = vpop.f32.mrf.mxu0  ;;  %v324_v63 = vpop.f32.mrf.mxu1  ;;  %v341_v0 = vmax.f32 %v281_v50, 0.0  ;;  %v357_v1 = vmax.f32 %v321_v51, 0.0 }
 0x11c   :  { %v342_v2 = vmax.f32 %v283_v58, 0.0  ;;  %v358_v3 = vmax.f32 %v323_v59, 0.0  ;;  %462 = vst [vmem:[#allocation7 + $0x28] sm:$0xff] %v536_v60  ;;  %470 = vst [vmem:[#allocation7 + $0x68] sm:$0xff] %v544_v61  ;;  %v285_v4 = vadd.f32 %v284_v62, %v717_v30  ;;  %v325_v5 = vadd.f32 %v324_v63, %v717_v30 }
 0x11d   :  { %v286_v6 = vpop.f32.mrf.mxu0  ;;  %v326_v7 = vpop.f32.mrf.mxu1 }
 0x11e   :  { %v537_v8 = vpack.c.bf16 %v342_v2, %v341_v0  ;;  %v545_v9 = vpack.c.bf16 %v358_v3, %v357_v1  ;;  %v287_v10 = vadd.f32 %v286_v6, %v719_v31  ;;  %v327_v11 = vadd.f32 %v326_v7, %v719_v31 }
 0x11f   :  { %v343_v12 = vmax.f32 %v285_v4, 0.0  ;;  %v359_v13 = vmax.f32 %v325_v5, 0.0 }
 0x120   :  { %463 = vst [vmem:[#allocation7 + $0x30] sm:$0xff] %v537_v8  ;;  %471 = vst [vmem:[#allocation7 + $0x70] sm:$0xff] %v545_v9  ;;  %v344_v14 = vmax.f32 %v287_v10, 0.0  ;;  %v360_v15 = vmax.f32 %v327_v11, 0.0 }
 0x122   :  { %v538_v16 = vpack.c.bf16 %v344_v14, %v343_v12  ;;  %v546_v17 = vpack.c.bf16 %v360_v15, %v359_v13 }
 0x124   :  { %464 = vst [vmem:[#allocation7 + $0x38] sm:$0xff] %v538_v16  ;;  %472 = vst [vmem:[#allocation7 + $0x78] sm:$0xff] %v546_v17 }
 0x125   :  { %654 = shalt.err (!%p651_p0)
}
 0x126   :  { %484 = dma.vmem_to_hbm [thread:$0]  %s479_s26, 2048, %s762_s3, [#allocation4], %s673_s22, %s673_s22, %s674_s23  }
 0x127   :  { %667 = dma.done.wait [#allocation4], 2048  }
 0x128   :  { %668 = vsyncadd [#allocation4], 4294965248 }
 0x129   :  { %488 = vsyncpa [#allocation3], 1 }
 0x12a   :  { %489 = vsyncpa [#allocation6], 1 }
 0x12b   :  { %490 = vsyncpa [#allocation4], 1 }

</bundles_post_ra>
